<compile_context>
chip_gen: v7x
topology: tpu7x:2x2x1
jax: 0.10.0
libtpu: 0.0.40
codegen_flags: <defaults>
</compile_context>

<pallas_src>
import functools

import jax
import jax.numpy as jnp
from jax import lax
from jax.experimental import pallas as pl
from jax.experimental.pallas import tpu as pltpu

_LANE = 128
_SUB = 8


def _round_up(x, m):
    return ((x + m - 1) // m) * m


def _round_down(x, m):
    return (x // m) * m


def _pool_sum_kernel(x_ref, o_ref, acc_ref, *, s_tile, tiles_per_core,
                     s_total, need_mask):
    """Accumulate partial pooled SUMS over the S (=T*H*W) axis.

    x_ref  : (n_tile, C, s_tile)  native dtype
    o_ref  : (1, n_tile, C) f32   partial sum for this (core, n-tile) pair
    acc_ref: (n_tile, C) f32 scratch
    """
    s_idx = pl.program_id(2)

    @pl.when(s_idx == 0)
    def _():
        acc_ref[...] = jnp.zeros_like(acc_ref)

    # Accumulate in f32 regardless of input dtype.
    x = x_ref[...].astype(jnp.float32)

    if need_mask:
        # Global (logical) S-tile index; may point at the ragged tail or, for a
        # duplicated (clamped) step on the second core, past the end of S.
        g = pl.program_id(0) * tiles_per_core + s_idx
        full_tiles = s_total // s_tile  # tiles whose every lane is in-bounds

        @pl.when(g < full_tiles)
        def _():
            acc_ref[...] += jnp.sum(x, axis=-1)

        @pl.when(g >= full_tiles)
        def _():
            # Mask lanes past the end of S (boundary blocks expose undefined
            # VMEM); a fully-out-of-range duplicated step contributes zero.
            lane = lax.broadcasted_iota(jnp.int32, x.shape, 2)
            valid = (g * s_tile + lane) < s_total
            acc_ref[...] += jnp.sum(jnp.where(valid, x, 0.0), axis=-1)
    else:
        acc_ref[...] += jnp.sum(x, axis=-1)

    @pl.when(s_idx == tiles_per_core - 1)
    def _():
        o_ref[0] = acc_ref[...]


def _fc_kernel(p_ref, w_ref, b_ref, o_ref):
    """Combine per-core partial sums and apply the classification Linear.

    p_ref: (n_splits, N_PAD, C) f32   partial pooled sums
    w_ref: (C, K_PAD) f32             W.T with 1/S pre-folded, zero-padded cols
    b_ref: (1, K_PAD) f32
    o_ref: (N_PAD, K_PAD) f32
    """
    # TODO(synk): training-mode dropout (stateful RNG mask) omitted;
    # eval-mode dropout is the identity, matching inference forward.
    pooled = jnp.sum(p_ref[...], axis=0)  # (N_PAD, C); 1/S folded into w_ref
    o_ref[...] = (jnp.dot(pooled, w_ref[...],
                          preferred_element_type=jnp.float32) + b_ref[...])


def simple_head_forward(x_ncthw, weight, bias):
    """x_ncthw: (N, C, T, H, W) any float dtype; weight: (K, C); bias: (K,)."""
    N, C, T, H, W = x_ncthw.shape
    K = weight.shape[0]
    S = T * H * W
    dtype = x_ncthw.dtype
    bytes_per = jnp.dtype(dtype).itemsize

    # --- generation-aware VMEM budgeting ---------------------------------
    try:
        vmem_cap = int(pltpu.get_tpu_info().vmem_capacity_bytes)
    except Exception:
        vmem_cap = 64 << 20  # conservative (v7x per-TC) fallback
    # Per x-buffer cap: big tiles amortize the ~0.35us/step overhead while
    # leaving room for 3-deep buffering + scratch + Mosaic internal scratch.
    cap_bytes = max(1 << 20, min(12 << 20, vmem_cap // 6))

    # --- N tiling (leading block dim: no (8,128) constraint) -------------
    n_tile = min(N, 128)
    if n_tile > _SUB and (cap_bytes // max(1, n_tile * C * bytes_per)) < 512:
        n_tile = _SUB  # keep contiguous DMA runs (s_tile) reasonably long
    n_grid = pl.cdiv(N, n_tile)
    n_pad = n_grid * n_tile  # padded rows only exist in the tiny outputs

    # --- S tiling: NO wrapper-side padding of x --------------------------
    col_bytes = max(1, n_tile * C * bytes_per)
    if S < 2 * _LANE:
        # Single full-extent S block (full-dim blocks are exempt from the
        # 128-divisibility rule); nothing worth splitting across cores.
        s_tile = S
    else:
        max_s_by_cap = max(_LANE, _round_down(cap_bytes // col_bytes, _LANE))
        s_floor = _round_down(S, _LANE)
        # Aim for >= 2 S tiles so the leading "core" axis feeds both v7x TCs.
        s_half = _round_up(pl.cdiv(S, 2), _LANE)
        s_tile = max(_LANE, min(max_s_by_cap, s_floor, s_half))
    s_tiles_total = pl.cdiv(S, s_tile)

    # Leading grid axis: split the S reduction across (up to) 2 TensorCores.
    n_splits = 2 if s_tiles_total >= 2 else 1
    tiles_per_core = pl.cdiv(s_tiles_total, n_splits)
    # Masking needed iff the last S tile is ragged or a core gets a duplicated
    # (clamped) step because the tile count is odd.
    need_mask = (S % s_tile != 0) or (n_splits * tiles_per_core != s_tiles_total)

    x3 = x_ncthw.reshape(N, C, S)  # trivial collapse, no data movement

    def x_index_map(c, n, s):
        # Clamp so a duplicated step re-reads a valid block (its contribution
        # is masked to zero in the kernel).
        return (n, 0, jnp.minimum(c * tiles_per_core + s, s_tiles_total - 1))

    # Pipeline depth for x: triple-buffer only when the S loop is long enough.
    x_spec_kwargs = {}
    num_x_buffers = 2
    if tiles_per_core >= 2:
        num_x_buffers = 3
        x_spec_kwargs = dict(pipeline_mode=pl.Buffered(3))
    x_block_bytes = n_tile * C * s_tile * bytes_per
    if num_x_buffers * x_block_bytes > (vmem_cap * 3) // 4:
        num_x_buffers = 2
        x_spec_kwargs = {}

    # vmem_limit sized to actual usage (+ slack for Mosaic internal scratch).
    out_block_bytes = n_tile * max(C, _LANE) * 4
    acc_bytes = _round_up(n_tile, _SUB) * max(C, _LANE) * 4
    vmem_needed = (num_x_buffers * x_block_bytes + 2 * out_block_bytes
                   + acc_bytes)
    vmem_limit = int(min(vmem_cap, vmem_needed + (8 << 20)))

    kernel = functools.partial(
        _pool_sum_kernel, s_tile=s_tile, tiles_per_core=tiles_per_core,
        s_total=S, need_mask=need_mask)

    partial_sums = pl.pallas_call(
        kernel,
        out_shape=jax.ShapeDtypeStruct((n_splits, n_pad, C), jnp.float32),
        grid_spec=pltpu.PrefetchScalarGridSpec(
            num_scalar_prefetch=0,
            grid=(n_splits, n_grid, tiles_per_core),
            in_specs=[
                pl.BlockSpec((n_tile, C, s_tile), x_index_map,
                             **x_spec_kwargs),
            ],
            out_specs=pl.BlockSpec((1, n_tile, C), lambda c, n, s: (c, n, 0)),
            scratch_shapes=[pltpu.VMEM((n_tile, C), jnp.float32)],
        ),
        compiler_params=pltpu.CompilerParams(
            dimension_semantics=("parallel", "parallel", "arbitrary"),
            vmem_limit_bytes=vmem_limit,
        ),
        cost_estimate=pl.CostEstimate(
            flops=N * C * S,
            transcendentals=0,
            bytes_accessed=N * C * S * bytes_per + n_splits * n_pad * C * 4,
        ),
    )(x3)

    # Tiny epilogue: combine per-core partials, scale by 1/S (folded into the
    # weights on the host), MXU matmul + bias.  Lane-dense K_PAD output.
    K_PAD = _round_up(max(K, _LANE), _LANE)
    wT = jnp.zeros((C, K_PAD), jnp.float32).at[:, :K].set(
        jnp.transpose(weight).astype(jnp.float32) * (1.0 / float(S)))
    b2 = jnp.zeros((1, K_PAD), jnp.float32).at[:, :K].set(
        bias.astype(jnp.float32))

    out = pl.pallas_call(
        _fc_kernel,
        out_shape=jax.ShapeDtypeStruct((n_pad, K_PAD), jnp.float32),
    )(partial_sums, wT, b2)

    return out[:N, :K]


if __name__ == "__main__":
    # Module config (synthetic, deterministic init — no checkpoint load).
    num_classes = 10
    in_channels = 32
    init_std = 0.01

    key = jax.random.PRNGKey(0)
    kx, kw = jax.random.split(key)

    # normal_init(fc_cls, std=init_std): weight ~ N(0, std), bias = 0
    fc_weight = init_std * jax.random.normal(
        kw, (num_classes, in_channels), dtype=jnp.float32)
    fc_bias = jnp.zeros((num_classes,), dtype=jnp.float32)

    # Test 1: small 3D-mode input, S divisible by the tile (clean split path).
    N, C, T, H, W = 2, in_channels, 4, 8, 8
    x = jax.random.normal(kx, (N, C, T, H, W), dtype=jnp.float32)
    out = jax.block_until_ready(simple_head_forward(x, fc_weight, fc_bias))
    ref = jnp.mean(x, axis=(2, 3, 4)) @ fc_weight.T + fc_bias
    assert out.shape == (N, num_classes)
    assert jnp.allclose(out, ref, atol=1e-5, rtol=1e-5)

    # Test 2: ragged S (= 5*7*8 = 280) exercising the in-kernel tail mask.
    T2, H2, W2 = 5, 7, 8
    x2 = jax.random.normal(kx, (N, C, T2, H2, W2), dtype=jnp.float32)
    out2 = jax.block_until_ready(simple_head_forward(x2, fc_weight, fc_bias))
    ref2 = jnp.mean(x2, axis=(2, 3, 4)) @ fc_weight.T + fc_bias
    assert out2.shape == (N, num_classes)
    assert jnp.allclose(out2, ref2, atol=1e-5, rtol=1e-5)

    print("KERNEL_OK")
</pallas_src>

<mosaic_0001>
module attributes {stable_mosaic.version = 11 : i64} {
  func.func @_pool_sum_kernel(%arg0: i32, %arg1: i32, %arg2: i32, %arg3: memref<2x32x128xf32, #tpu.memory_space<vmem>>, %arg4: memref<1x2x32xf32, #tpu.memory_space<vmem>>, %arg5: memref<2x32xf32, #tpu.memory_space<vmem>>) attributes {dimension_semantics = [#tpu.dimension_semantics<parallel>, #tpu.dimension_semantics<parallel>, #tpu.dimension_semantics<arbitrary>], iteration_bounds = array<i64: 2, 1, 1>, scalar_prefetch = 0 : i64, scratch_operands = 1 : i64, tpu.core_type = #tpu.core_type<tc>, window_params = [{transform_indices = @transform_0, window_bounds = array<i64: 2, 32, 128>}, {transform_indices = @transform_1, window_bounds = array<i64: 1, 2, 32>}]} {
    %c0_i32 = arith.constant 0 : i32
    %0 = arith.cmpi eq, %arg2, %c0_i32 : i32
    %1 = arith.extui %0 : i1 to i32
    %c0_i32_0 = arith.constant 0 : i32
    %2 = arith.cmpi ne, %1, %c0_i32_0 : i32
    scf.if %2 {
      %cst_9 = arith.constant 0.000000e+00 : f32
      %11 = vector.broadcast %cst_9 : f32 to vector<2x32xf32>
      %c0_10 = arith.constant 0 : index
      %c0_11 = arith.constant 0 : index
      %12 = vector.load %arg5[%c0_10, %c0_11] : memref<2x32xf32, #tpu.memory_space<vmem>>, vector<2x32xf32>
      tpu.vector_store %arg5[%c0_10, %c0_11], %11 {strides = array<i32>} : memref<2x32xf32, #tpu.memory_space<vmem>>, vector<2x32xf32>,
    } else {
    }
    %c0 = arith.constant 0 : index
    %c0_1 = arith.constant 0 : index
    %c0_2 = arith.constant 0 : index
    %3 = vector.load %arg3[%c0, %c0_1, %c0_2] : memref<2x32x128xf32, #tpu.memory_space<vmem>>, vector<2x32x128xf32>
    %c0_3 = arith.constant 0 : index
    %c0_4 = arith.constant 0 : index
    %4 = vector.load %arg5[%c0_3, %c0_4] : memref<2x32xf32, #tpu.memory_space<vmem>>, vector<2x32xf32>
    %cst = arith.constant dense<0.000000e+00> : vector<2x32xf32>
    %5 = vector.multi_reduction <add>, %3, %cst [2] : vector<2x32x128xf32> to vector<2x32xf32>
    %6 = arith.addf %4, %5 : vector<2x32xf32>
    %c0_5 = arith.constant 0 : index
    %c0_6 = arith.constant 0 : index
    %7 = vector.load %arg5[%c0_5, %c0_6] : memref<2x32xf32, #tpu.memory_space<vmem>>, vector<2x32xf32>
    tpu.vector_store %arg5[%c0_5, %c0_6], %6 {strides = array<i32>} : memref<2x32xf32, #tpu.memory_space<vmem>>, vector<2x32xf32>,
    %c0_i32_7 = arith.constant 0 : i32
    %8 = arith.cmpi eq, %arg2, %c0_i32_7 : i32
    %9 = arith.extui %8 : i1 to i32
    %c0_i32_8 = arith.constant 0 : i32
    %10 = arith.cmpi ne, %9, %c0_i32_8 : i32
    scf.if %10 {
      %c0_9 = arith.constant 0 : index
      %c0_10 = arith.constant 0 : index
      %11 = vector.load %arg5[%c0_9, %c0_10] : memref<2x32xf32, #tpu.memory_space<vmem>>, vector<2x32xf32>
      %c0_11 = arith.constant 0 : index
      %c0_12 = arith.constant 0 : index
      %c0_13 = arith.constant 0 : index
      %12 = vector.load %arg4[%c0_11, %c0_12, %c0_13] : memref<1x2x32xf32, #tpu.memory_space<vmem>>, vector<1x2x32xf32>
      %13 = vector.shape_cast %12 : vector<1x2x32xf32> to vector<2x32xf32>
      %14 = vector.shape_cast %11 : vector<2x32xf32> to vector<1x2x32xf32>
      tpu.vector_store %arg4[%c0_11, %c0_12, %c0_13], %14 {strides = array<i32>} : memref<1x2x32xf32, #tpu.memory_space<vmem>>, vector<1x2x32xf32>,
    } else {
    }
    return
  }
  func.func @transform_0(%arg0: i32, %arg1: i32, %arg2: i32) -> (i32, i32, i32) {
    %c1_i32 = arith.constant 1 : i32
    %0 = arith.muli %arg0, %c1_i32 : i32
    %1 = arith.addi %0, %arg2 : i32
    %c1_i32_0 = arith.constant 1 : i32
    %2 = arith.minsi %1, %c1_i32_0 : i32
    %c0_i32 = arith.constant 0 : i32
    %c0_i32_1 = arith.constant 0 : i32
    return %arg1, %c0_i32, %2 : i32, i32, i32
  }
  func.func @transform_1(%arg0: i32, %arg1: i32, %arg2: i32) -> (i32, i32, i32) {
    %c0_i32 = arith.constant 0 : i32
    %c0_i32_0 = arith.constant 0 : i32
    return %arg0, %arg1, %c0_i32 : i32, i32, i32
  }
}

</mosaic_0001>

<bundles_post_ra>
// kernel: tpu_custom_call.1
= control target key start
LH: loop header
LB: loop body
LE: loop exit
PB: predicated region body
PF: predicated region fallthrough
CT: control target
= control target key end

     0   :  { %6 = vsyncpa [#allocation4], 0  ;;  %s833_s0 = inlined_call_operand.hbm [shape: f32[2,32,256], index: 0, kind: input, shape index: {}]   ;;  %s834_s1 = inlined_call_operand.hbm [shape: f32[2,2,32], index: 1, kind: output, shape index: {}]  }
   0x1   :  { %8 = vsyncpa [#allocation4 + $0x1], 0 }
   0x2   :  { %9 = vsyncpa [#allocation5], 0 }
   0x3   :  { %11 = vsyncpa [#allocation5 + $0x1], 0  ;;  %s625_s6 = smov 0   ;;  %s627_s7 = smov 0  }
   0x4   :  { %s629_s8 = smov 0   ;;  %s631_s9 = smov 0  }
   0x5   :  { %s633_s10 = smov 0   ;;  %s635_s11 = smov 0  }
   0x6   :  { %s637_s12 = smov 0   ;;  %s639_s13 = smov 0  }
   0x7   :  { %s641_s14 = smov 0  }
   0x8 LB: > { %s368_s15 = sadd.s32 4294967295, %s607_s14   ;;  %s369_s16 = sadd.s32 4294967294, %s607_s14   ;;  %s607_s14 = sphi %s641_s14, %s17_s14   ;;  %s603_s13 = sphi %s639_s13, %s852_s13   ;;  %s599_s12 = sphi %s637_s12, %s851_s12   ;;  %s595_s11 = sphi %s635_s11, %s850_s11   ;;  %s591_s10 = sphi %s633_s10, %s849_s10   ;;  %s587_s9 = sphi %s631_s9, %s848_s9   ;;  %s583_s8 = sphi %s629_s8, %s847_s8   ;;  %s579_s7 = sphi %s627_s7, %s846_s7   ;;  %s575_s6 = sphi %s625_s6, %s845_s6  }
   0x9   : > { %s36_s17 = sadd.s32 1, %s603_s13  ;;  %p41_p0 = scmp.lt.s32.totalorder %s603_s13, 1 }
   0xa   : > { %p38_p1 = scmp.ge.s32.totalorder %s36_s17, 2  ;;  %s51_s18 = sadd.s32 1, %s595_s11 }
   0xb   : > { %s674_s19 = scalar_select %p41_p0, %s603_s13, 1 }
   0xc   : > { %s854_s17 = smov (%p38_p1, %s36_s17), 0  ;;  %p58_p2 = scmp.ne.s32.totalorder %s595_s11, %s591_s10 }
   0xd   : > { %p59_p3 = scmp.eq.s32.totalorder %s607_s14, 0  ;;  %p44_p4 = scmp.lt.s32.totalorder %s854_s17, 1 }
   0xe   : > { %p64_p5 = scmp.ne.s32.totalorder %s591_s10, %s587_s9  ;;  %p65_p7 = scmp.eq.s32.totalorder %s368_s15, 0 }
   0xf   : > { %p683_p6 = por %p59_p3, %p58_p2  ;;  %s74_s23 = ssub.s32 %s603_s13, %s854_s17 }
  0x10   : > { %s45_s21 = scalar_select %p44_p4, %s854_s17, 1 }
  0x11   : > { %p688_p8 = por %p65_p7, %p64_p5  ;;  %p77_p9 = scmp.eq.s32.totalorder %s74_s23, 0 }
  0x12   : > { %s47_s24 = ssub.s32 %s674_s19, %s45_s21  ;;  %s79_s25 = sadd.s32 1, %s583_s8 }
  0x13   : > { %p49_p10 = scmp.eq.s32.totalorder %s47_s24, 0  ;;  %p89_p11 = scmp.ne.s32.totalorder %s583_s8, %s579_s7 }
  0x14   : > { %s697_s26 = scalar_select %p77_p9, %s583_s8, %s79_s25  }
  0x15   : > { %s700_s27 = scalar_select %p49_p10, %s595_s11, %s51_s18  }
  0x16   : > { %p90_p12 = scmp.eq.s32.totalorder %s368_s15, 1  ;;  %p95_p13 = scmp.ne.s32.totalorder %s579_s7, %s575_s6 }
  0x17   : > { %p96_p0 = scmp.eq.s32.totalorder %s369_s16, 1  ;;  %p393_p4 = scmp.lt.s32.totalorder %s607_s14, 2 }
  0x18   : > { %p706_p1 = por %p90_p12, %p89_p11  ;;  %s116_s30 = sand.u32 1, %s595_s11  }
  0x19   : > { %p711_p3 = por %p96_p0, %p95_p13  ;;  %s373_s2 = sshll.u32 %s674_s19, 7 }
  0x1a   : > { %s838_s28 = scalar_select %p706_p1, 1, 0 }
  0x1b   : > { %s839_s29 = scalar_select %p711_p3, 1, 0 }
  0x1c   : > { %s372_s3 = sshll.u32 %s116_s30, 6  ;;  %s721_s9 = scalar_lea.hbm %s833_s0, %s373_s2 }
  0x1d   : > { %s120_s15 = scalar_lea.vmem [#allocation3], %s372_s3  ;;  %p725_p5 = pnand %p393_p4, %p683_p6 }
  0x1e   : > { %s132_s16 = sshll.u32 %s120_s15, 4  ;;  %s732_s19 = scalar_lea.sflag [#allocation4], %s116_s30  ;;  %s729_s16 = int_to_ptr.vmem [resolvable:$true] %s132_s16 }
  0x1f   : > { %s471_s21 = scalar_lea.hbm %s721_s9, 1024  ;;  %p473_p10 = pneg %p725_p5 }
  0x20   : > { %p472_p9 = scmp.ne.s32.totalorder %s721_s9, %s471_s21  ;;  %s476_s24 = scalar_lea.hbm %s833_s0, 2048 }
  0x21   : > { %p477_p6 = scmp.lt.u32.totalorder %s721_s9, %s833_s0  ;;  %p478_p13 = scmp.lt.u32.totalorder %s476_s24, %s471_s21 }
  0x22   : > { %p474_p11 = pnand %p473_p10, %p472_p9  ;;  %p480_p4 = scmp.lt.u32.totalorder %s471_s21, %s721_s9 }
  0x23   : > { %p479_p0 = por %p478_p13, %p477_p6 }
  0x24   : > { %p475_p12 = pneg %p474_p11 }
  0x25   : > { %p481_p2 = por %p480_p4, %p479_p0 }
  0x27   : > { %p482_p7 = pnand %p481_p2, %p475_p12 }
  0x29   : > { %485 = shalt.err (!%p482_p7)
}
  0x2a   : > { %s486_s30 = scalar_lea.vmem %s729_s16, 1024  ;;  %s609_s3 = smov [#allocation3]  }
  0x2b   : > { %p487_p9 = scmp.ne.s32.totalorder %s729_s16, %s486_s30  ;;  %s491_s4 = sshll.u32 %s609_s3, 4  ;;  %s492_s4 = int_to_ptr.vmem [resolvable:$false] %s491_s4 }
  0x2c   : > { %s493_s5 = scalar_lea.vmem %s492_s4, 2048  ;;  %p494_p1 = scmp.lt.s32.totalorder %s729_s16, %s492_s4 }
  0x2d   : > { %p489_p11 = pnand %p487_p9, %p473_p10  ;;  %p495_p6 = scmp.lt.s32.totalorder %s493_s5, %s486_s30 }
  0x2f   : > { %p490_p3 = pneg %p489_p11  ;;  %p496_p13 = por %p495_p6, %p494_p1 }
  0x31   : > { %p497_p0 = pnand %p496_p13, %p490_p3 }
  0x33   : > { %500 = shalt.err (!%p497_p0)
}
  0x34   : > { %s610_s15 = smov 256   ;;  %s611_s21 = smov 128  }
  0x35   : > { %s612_s20 = smov 8   ;;  %p140_p2 = scmp.lt.s32.totalorder %s607_s14, 3 }
  0x36   : > { %388 = dma.hbm_to_vmem [thread:$0]  (!%p725_p5), %s721_s9, 1024, %s729_s16, %s732_s19, %s610_s15, %s611_s21, %s612_s20  }
  0x37   : > { %p841_p7 = scmp.ge.s32.totalorder %s607_s14, 1 }
  0x39   : > { %p141_p10 = pnand %p841_p7, %p140_p2 }
  0x3a   : > { %s146_s23 = sand.u32 (!%p141_p10), 1, %s591_s10  }
  0x3b   : > { %144 = sbr.rel (%p141_p10) target bundleno = 251 (0xfb), region = 24  ;;  %s375_s24 = sshll.u32 (!%p141_p10), %s146_s23, 6 }
  0x3c   : > { %s147_s25 = scalar_lea.sflag (!%p141_p10), [#allocation4], %s146_s23  ;;  %s150_s2 = scalar_lea.vmem (!%p141_p10), [#allocation3], %s375_s24 }
  0x42   : > { %566 = dma.done.wait (%p688_p8), %s147_s25, 1024  }
  0x43   : > { %568 = vsyncadd (%p688_p8), %s147_s25, 4294966272  ;;  %v183_v0 = vld [vmem:[%s150_s2 + $0x20] sm:$0xff]  ;;  %v184_v2 = vld [vmem:[%s150_s2 + $0x28] sm:$0xff]  ;;  %vm177_vm0 = vcmask 254976   ;;  %v613_v8 = vmov 0.0   ;;  %v212_v9 = vlaneseq  ;;  %vm223_vm1 = vcmask 130112  }
  0x44   : > { %v179_v1 = vld [vmem:[%s150_s2] sm:$0xff]  ;;  %196 = vadd.xlane.f32.xlu1 %v183_v0  ;;  %v180_v3 = vld [vmem:[%s150_s2 + $0x8] sm:$0xff]  ;;  %v185_v4 = vld [vmem:[%s150_s2 + $0x30] sm:$0xff]  ;;  %178 = vst.msk [vmem:[#allocation2] sm:$0x3] %vm177_vm0, %v613_v8  ;;  %vm230_vm2 = vcmask 195712  }
  0x45   : > { %188 = vadd.xlane.f32.xlu0 %v179_v1  ;;  %v181_v5 = vld [vmem:[%s150_s2 + $0x10] sm:$0xff]  ;;  %v186_v6 = vld [vmem:[%s150_s2 + $0x38] sm:$0xff]  ;;  %v213_v10 = vand.u32 127, %v212_v9  ;;  %v215_v15 = vshrl.u32 %v212_v9, 7  ;;  %vm237_vm3 = vcmask 261312   ;;  %vm258_vm4 = vcmask 1041409  }
  0x46   : > { %v182_v7 = vld [vmem:[%s150_s2 + $0x18] sm:$0xff]  ;;  %s166_s22 = sand.u32 1, %s579_s7   ;;  %s378_s16 = sshll.u32 %s599_s12, 5 }
  0x47   : > { %v218_v13 = vadd.s32 4294967288, %v213_v10  ;;  %v225_v14 = vadd.s32 4294967280, %v213_v10  ;;  %v232_v19 = vadd.s32 4294967272, %v213_v10  ;;  %v216_v21 = vsub.s32 %v213_v10, %v215_v15  ;;  %s376_s9 = sshll.u32 %s166_s22, 1  ;;  %s775_s4 = scalar_lea.hbm %s834_s1, %s378_s16 }
  0x48   : > { %198 = vadd.xlane.f32.xlu1 %v184_v2  ;;  %s168_s18 = scalar_lea.vmem [#allocation6], %s376_s9  ;;  %s270_s5 = scalar_lea.sflag [#allocation5], %s166_s22 }
  0x49   : > { %190 = vadd.xlane.f32.xlu0 %v180_v3  ;;  %v221_v18 = vsub.s32 %v218_v13, %v215_v15  ;;  %v228_v20 = vsub.s32 %v225_v14, %v215_v15  ;;  %v235_v26 = vsub.s32 %v232_v19, %v215_v15  ;;  %s284_s19 = sshll.u32 %s168_s18, 4  ;;  %p842_p1 = scmp.ne.s32.totalorder %s838_s28, 0  ;;  %s777_s19 = int_to_ptr.vmem [resolvable:$true] %s284_s19 }
  0x4a   : > { %s501_s15 = scalar_lea.vmem %s777_s19, 32  ;;  %s614_s12 = smov [#allocation6]  }
  0x4b   : > { %v187_v39 = vld [vmem:[#allocation2] sm:$0x3]  ;;  %p502_p8 = scmp.ne.s32.totalorder %s777_s19, %s501_s15  ;;  %s505_s21 = sshll.u32 %s614_s12, 4  ;;  %s506_s21 = int_to_ptr.vmem [resolvable:$false] %s505_s21 }
  0x4c   : > { %200 = vadd.xlane.f32.xlu1 %v185_v4  ;;  %s507_s20 = scalar_lea.vmem %s506_s21, 64  ;;  %p508_p12 = scmp.lt.s32.totalorder %s777_s19, %s506_s21 }
  0x4d   : > { %192 = vadd.xlane.f32.xlu0 %v181_v5  ;;  %p503_p3 = pnand %p502_p8, %p842_p1  ;;  %p509_p4 = scmp.lt.s32.totalorder %s507_s20, %s501_s15 }
  0x4f   : > { %p504_p5 = pneg %p503_p3  ;;  %p510_p9 = por %p509_p4, %p508_p12 }
  0x50   : > { %202 = vadd.xlane.f32.xlu1 %v186_v6 }
  0x51   : > { %194 = vadd.xlane.f32.xlu0 %v182_v7  ;;  %p511_p11 = pnand %p510_p9, %p504_p5 }
  0xd1   : > { %v197_v11 = vpop.xlane.xlu1 %196 }
  0xd2   : > { %v189_v12 = vpop.xlane.xlu0 %188  ;;  %v242_v29 = vrot.slane %v197_v11, %v216_v21 }
  0xd3   : > { %v217_v30 = vrot.slane %v189_v12, %v216_v21 }
  0xd5   : > { %v199_v16 = vpop.xlane.xlu1 %198 }
  0xd6   : > { %v191_v17 = vpop.xlane.xlu0 %190  ;;  %v246_v24 = vrot.slane %v199_v16, %v221_v18 }
  0xd7   : > { %v222_v25 = vrot.slane %v191_v17, %v221_v18 }
  0xd8   : > { %v247_v33 = vsel %vm223_vm1, %v246_v24, %v242_v29 }
  0xd9   : > { %v201_v22 = vpop.xlane.xlu1 %200  ;;  %v224_v34 = vsel %vm223_vm1, %v222_v25, %v217_v30 }
  0xda   : > { %v193_v23 = vpop.xlane.xlu0 %192  ;;  %v251_v27 = vrot.slane %v201_v22, %v228_v20 }
  0xdb   : > { %v229_v28 = vrot.slane %v193_v23, %v228_v20 }
  0xdc   : > { %v252_v37 = vsel %vm230_vm2, %v251_v27, %v247_v33 }
  0xdd   : > { %v203_v31 = vpop.xlane.xlu1 %202  ;;  %v231_v38 = vsel %vm230_vm2, %v229_v28, %v224_v34 }
  0xde   : > { %v195_v32 = vpop.xlane.xlu0 %194  ;;  %v256_v35 = vrot.slane %v203_v31, %v235_v26 }
  0xdf   : > { %v236_v36 = vrot.slane %v195_v32, %v235_v26 }
  0xe0   : > { %v257_v40 = vsel %vm237_vm3, %v256_v35, %v252_v37 }
  0xe1   : > { %v238_v41 = vsel %vm237_vm3, %v236_v36, %v231_v38 }
  0xe2   : > { %v259_v42 = vsel %vm258_vm4, %v257_v40, %v238_v41 }
  0xe3   : > { %v261_v43 = vadd.f32 %v259_v42, %v187_v39 }
  0xe5   : > { %263 = vst.msk [vmem:[#allocation2] sm:$0x3] %vm177_vm0, %v261_v43 }
  0xec   : > { %v267_v44 = vld [vmem:[#allocation2] sm:$0x3] }
  0xed   : > { %268 = vst.msk [vmem:[%s168_s18] sm:$0x3] %vm177_vm0, %v267_v44 }
  0xee   : > { %514 = shalt.err (!%p511_p11)
}
  0xef   : > { %s515_s23 = scalar_lea.hbm %s775_s4, 32  ;;  %s519_s2 = scalar_lea.hbm %s834_s1, 64 }
  0xf0   : > { %p516_p6 = scmp.ne.s32.totalorder %s775_s4, %s515_s23  ;;  %p520_p2 = scmp.lt.u32.totalorder %s775_s4, %s834_s1 }
  0xf1   : > { %p521_p7 = scmp.lt.u32.totalorder %s519_s2, %s515_s23  ;;  %p523_p8 = scmp.lt.u32.totalorder %s515_s23, %s775_s4 }
  0xf2   : > { %p517_p13 = pnand %p516_p6, %p842_p1 }
  0xf3   : > { %p522_p10 = por %p521_p7, %p520_p2 }
  0xf4   : > { %p518_p0 = pneg %p517_p13 }
  0xf5   : > { %p524_p3 = por %p523_p8, %p522_p10 }
  0xf7   : > { %p525_p5 = pnand %p524_p3, %p518_p0 }
  0xf9   : > { %528 = shalt.err (!%p525_p5)
}
  0xfa   : > { %383 = dma.vmem_to_hbm [thread:$0]  (%p842_p1), %s777_s19, 32, %s775_s4, %s270_s5  }
  0xfb PF: > { %s296_s16 = sand.u32 1, %s575_s6   ;;  %p843_p12 = scmp.ne.s32.totalorder %s839_s29, 0 }
  0xfc   : > { %p844_p4 = scmp.ge.s32.totalorder %s607_s14, 2  ;;  %s297_s18 = scalar_lea.sflag [#allocation5], %s296_s16 }
  0xfe   : > { %p390_p9 = pnand %p844_p4, %p843_p12 }
 0x100   : > { %570 = dma.done.wait (!%p390_p9), %s297_s18, 32  }
 0x101   : > { %572 = vsyncadd (!%p390_p9), %s297_s18, 4294967264  ;;  %s17_s14 = sadd.s32 1, %s607_s14   ;;  %s845_s6 = smov %s579_s7 }
 0x102   : > { %p14_p11 = scmp.ge.s32.totalorder %s17_s14, 4   ;;  %s846_s7 = smov %s583_s8 }
 0x103   : > { %s847_s8 = smov %s697_s26  ;;  %s848_s9 = smov %s591_s10 }
 0x104   : > { %s849_s10 = smov %s595_s11  ;;  %s850_s11 = smov %s700_s27 }
 0x105   : > { %s851_s12 = smov %s603_s13  ;;  %s852_s13 = smov %s854_s17 }
 0x106   :  { %16 = sbr.rel (!%p14_p11) target bundleno = 8 (0x8), region = 77 }
 0x10d   :  { %302 = vsyncpa [#allocation4], 1 }
 0x10e   :  { %304 = vsyncpa [#allocation4 + $0x1], 1 }
 0x10f   :  { %305 = vsyncpa [#allocation5], 1 }
 0x110   :  { %307 = vsyncpa [#allocation5 + $0x1], 1 }

</bundles_post_ra>
